<compile_context>
chip_gen: v5e
topology: v5e:2x2
jax: 0.10.0
libtpu: 0.0.40
codegen_flags: <defaults>
</compile_context>

<pallas_src>
import math
from functools import partial

import jax
import jax.numpy as jnp
from jax.experimental import pallas as pl
from jax.experimental.pallas import tpu as pltpu


# ---------------------------------------------------------------------------
# Parameter setup: pe buffer, identical to the PyTorch __init__ construction.
# ---------------------------------------------------------------------------
def make_positional_encoding_table(d_model: int, max_len: int = 1024,
                                   dtype=jnp.float32) -> jnp.ndarray:
    """Returns pe of shape (max_len, 1, d_model)."""
    # Same latent constraint as the PyTorch original (pe[:, 1::2] needs d_model even).
    assert d_model % 2 == 0, "d_model must be even"
    position = jnp.arange(0, max_len, dtype=jnp.float32)[:, None]          # (max_len, 1)
    div_term = jnp.exp(
        jnp.arange(0, d_model, 2, dtype=jnp.float32) * (-math.log(10000.0) / d_model)
    )                                                                        # (d_model//2,)
    angles = position * div_term                                             # (max_len, d//2)
    pe = jnp.zeros((max_len, d_model), dtype=jnp.float32)
    pe = pe.at[:, 0::2].set(jnp.sin(angles))
    pe = pe.at[:, 1::2].set(jnp.cos(angles))
    # unsqueeze(0).transpose(0, 1) -> (max_len, 1, d_model)
    return pe[:, None, :].astype(dtype)


# ---------------------------------------------------------------------------
# Kernels
# ---------------------------------------------------------------------------
def _pe_add_kernel_3d(x_ref, pe_ref, o_ref):
    # x_ref: (ts, B, D); pe_ref: (ts, 1, D) -> broadcast over the batch (sublane) axis.
    o_ref[...] = x_ref[...] + pe_ref[...]


def _pe_add_kernel_2d(x_ref, pe_ref, o_ref, *, batch, d_model):
    # x_ref / o_ref: (ts, B*D) lane-dense; pe_ref: (ts, D).
    # pe is read once per row and reused for every batch chunk via static,
    # lane-aligned (D % 128 == 0) ref slices -> dense unmasked vld/vst, no tiling
    # of pe in HBM and no in-kernel relayout.
    pe = pe_ref[...]
    for b in range(batch):  # static unroll over the (small) batch
        sl = slice(b * d_model, (b + 1) * d_model)
        o_ref[:, sl] = x_ref[:, sl] + pe


# ---------------------------------------------------------------------------
# Wrapper
# ---------------------------------------------------------------------------
def _choose_block_rows(seq_len: int, row_bytes: int,
                       target_bytes: int = 2 * 1024 * 1024) -> int:
    """~2 MiB x-blocks: big enough to hit HBM roofline, small enough that
    double-buffered (x, out, pe) blocks fit every generation's scoped VMEM."""
    rows = max(1, target_bytes // max(row_bytes, 1))
    if rows >= seq_len:
        return seq_len
    rows = max(8, (rows // 8) * 8)
    return min(rows, seq_len)


def positional_encoding_forward(x: jnp.ndarray, pe: jnp.ndarray,
                                *, block_rows: int | None = None) -> jnp.ndarray:
    """Eval-mode forward: x + pe[:S] (dropout omitted).

    x:  (S, B, D)
    pe: (max_len, 1, D), max_len >= S
    """
    S, B, D = x.shape
    assert pe.shape[0] >= S and pe.shape[1] == 1 and pe.shape[2] == D
    itemsize = jnp.dtype(x.dtype).itemsize

    # Align dtypes so the in-kernel add runs natively in x.dtype.
    pe_slice = pe[:S].astype(x.dtype)  # (S, 1, D)

    # Tile the sequence axis.
    if block_rows is None:
        ts = _choose_block_rows(S, B * D * itemsize)
    else:
        ts = int(block_rows)
    if ts >= S:
        ts = S                                  # full extent is always legal
    else:
        ts = min(max(8, (ts // 8) * 8), S)      # multiple of 8 (sublane axis in 2-D path)
    grid = (pl.cdiv(S, ts),)                    # partial trailing block is masked by Pallas

    compiler_params = pltpu.CompilerParams(
        dimension_semantics=("parallel",),      # many steps -> megacore sharding on v7x
        vmem_limit_bytes=32 * 1024 * 1024,      # safe on v5e/v6e (128 MiB) and v7x (64 MiB)
    )

    lane_dense = (D % 128 == 0)

    if lane_dense:
        # Lane-dense 2-D view: second-to-last dim = ts (multiple of 8 or full),
        # last dim = B*D (multiple of 128) -> unmasked full-width loads/stores.
        x2 = x.reshape(S, B * D)                # contiguous merge: free view
        pe2 = pe_slice.reshape(S, D)
        out2 = pl.pallas_call(
            partial(_pe_add_kernel_2d, batch=B, d_model=D),
            out_shape=jax.ShapeDtypeStruct((S, B * D), x.dtype),
            grid_spec=pltpu.PrefetchScalarGridSpec(
                num_scalar_prefetch=0,
                grid=grid,
                in_specs=[
                    pl.BlockSpec((ts, B * D), lambda i: (i, 0)),
                    pl.BlockSpec((ts, D), lambda i: (i, 0)),
                ],
                out_specs=pl.BlockSpec((ts, B * D), lambda i: (i, 0)),
            ),
            compiler_params=compiler_params,
        )(x2, pe2)
        return out2.reshape(S, B, D)

    # Fallback for small / lane-unaligned d_model: (ts, B, D) blocks with the full
    # (B, D) extents in the last two dims (satisfies the (8, 128) rule) and a
    # sublane broadcast of pe over the batch axis.
    return pl.pallas_call(
        _pe_add_kernel_3d,
        out_shape=jax.ShapeDtypeStruct((S, B, D), x.dtype),
        grid_spec=pltpu.PrefetchScalarGridSpec(
            num_scalar_prefetch=0,
            grid=grid,
            in_specs=[
                pl.BlockSpec((ts, B, D), lambda i: (i, 0, 0)),
                pl.BlockSpec((ts, 1, D), lambda i: (i, 0, 0)),
            ],
            out_specs=pl.BlockSpec((ts, B, D), lambda i: (i, 0, 0)),
        ),
        compiler_params=compiler_params,
    )(x, pe_slice)


def _reference(x: jnp.ndarray, pe: jnp.ndarray) -> jnp.ndarray:
    return x + pe[: x.shape[0]].astype(x.dtype)


if __name__ == "__main__":
    key = jax.random.PRNGKey(0)
    k1, k2, k3 = jax.random.split(key, 3)

    # Case A: small shapes consistent with the module's (seq, batch, d_model) usage.
    #         D=32 is lane-unaligned -> exercises the 3-D fallback path.
    seq, batch, d_model = 8, 2, 32
    pe_a = make_positional_encoding_table(d_model, max_len=1024)
    x_a = jax.random.normal(k1, (seq, batch, d_model), dtype=jnp.float32)
    out_a = jax.block_until_ready(positional_encoding_forward(x_a, pe_a))
    ref_a = _reference(x_a, pe_a)
    assert out_a.shape == (seq, batch, d_model)
    assert jnp.allclose(out_a, ref_a, atol=1e-6, rtol=1e-6), "case A mismatch"

    # Case B: lane-dense path (D=128), multiple pipelined grid steps and a partial
    #         trailing block (200 = 3*64 + 8).
    seq_b, batch_b, d_model_b = 200, 2, 128
    pe_b = make_positional_encoding_table(d_model_b, max_len=1024)
    x_b = jax.random.normal(k2, (seq_b, batch_b, d_model_b), dtype=jnp.float32)
    out_b = jax.block_until_ready(
        positional_encoding_forward(x_b, pe_b, block_rows=64))
    ref_b = _reference(x_b, pe_b)
    assert jnp.allclose(out_b, ref_b, atol=1e-6, rtol=1e-6), "case B mismatch"

    # Case C: 3-D fallback path with multiple grid steps and a partial trailing
    #         block (100 = 3*32 + 4).
    seq_c, batch_c, d_model_c = 100, 3, 32
    pe_c = make_positional_encoding_table(d_model_c, max_len=1024)
    x_c = jax.random.normal(k3, (seq_c, batch_c, d_model_c), dtype=jnp.float32)
    out_c = jax.block_until_ready(
        positional_encoding_forward(x_c, pe_c, block_rows=32))
    ref_c = _reference(x_c, pe_c)
    assert jnp.allclose(out_c, ref_c, atol=1e-6, rtol=1e-6), "case C mismatch"

    print("KERNEL_OK")
</pallas_src>

<mosaic_0001>
module attributes {stable_mosaic.version = 11 : i64} {
  func.func @_pe_add_kernel_3d(%arg0: i32, %arg1: memref<8x2x32xf32, #tpu.memory_space<vmem>>, %arg2: memref<8x1x32xf32, #tpu.memory_space<vmem>>, %arg3: memref<8x2x32xf32, #tpu.memory_space<vmem>>) attributes {dimension_semantics = [#tpu.dimension_semantics<parallel>], iteration_bounds = array<i64: 1>, scalar_prefetch = 0 : i64, scratch_operands = 0 : i64, tpu.core_type = #tpu.core_type<tc>, window_params = [{transform_indices = @transform_0, window_bounds = array<i64: 8, 2, 32>}, {transform_indices = @transform_1, window_bounds = array<i64: 8, 1, 32>}, {transform_indices = @transform_2, window_bounds = array<i64: 8, 2, 32>}]} {
    %c0 = arith.constant 0 : index
    %c0_0 = arith.constant 0 : index
    %c0_1 = arith.constant 0 : index
    %0 = vector.load %arg1[%c0, %c0_0, %c0_1] : memref<8x2x32xf32, #tpu.memory_space<vmem>>, vector<8x2x32xf32>
    %c0_2 = arith.constant 0 : index
    %c0_3 = arith.constant 0 : index
    %c0_4 = arith.constant 0 : index
    %1 = vector.load %arg2[%c0_2, %c0_3, %c0_4] : memref<8x1x32xf32, #tpu.memory_space<vmem>>, vector<8x1x32xf32>
    %2 = vector.broadcast %1 : vector<8x1x32xf32> to vector<8x2x32xf32>
    %3 = arith.addf %0, %2 : vector<8x2x32xf32>
    %c0_5 = arith.constant 0 : index
    %c0_6 = arith.constant 0 : index
    %c0_7 = arith.constant 0 : index
    %4 = vector.load %arg3[%c0_5, %c0_6, %c0_7] : memref<8x2x32xf32, #tpu.memory_space<vmem>>, vector<8x2x32xf32>
    tpu.vector_store %arg3[%c0_5, %c0_6, %c0_7], %3 {strides = array<i32>} : memref<8x2x32xf32, #tpu.memory_space<vmem>>, vector<8x2x32xf32>,
    return
  }
  func.func @transform_0(%arg0: i32) -> (i32, i32, i32) {
    %c0_i32 = arith.constant 0 : i32
    %c0_i32_0 = arith.constant 0 : i32
    %c0_i32_1 = arith.constant 0 : i32
    return %arg0, %c0_i32, %c0_i32_0 : i32, i32, i32
  }
  func.func @transform_1(%arg0: i32) -> (i32, i32, i32) {
    %c0_i32 = arith.constant 0 : i32
    %c0_i32_0 = arith.constant 0 : i32
    %c0_i32_1 = arith.constant 0 : i32
    return %arg0, %c0_i32, %c0_i32_0 : i32, i32, i32
  }
  func.func @transform_2(%arg0: i32) -> (i32, i32, i32) {
    %c0_i32 = arith.constant 0 : i32
    %c0_i32_0 = arith.constant 0 : i32
    %c0_i32_1 = arith.constant 0 : i32
    return %arg0, %c0_i32, %c0_i32_0 : i32, i32, i32
  }
}

</mosaic_0001>

<bundles_post_ra>
// kernel: tpu_custom_call.1
= control target key start
LH: loop header
LB: loop body
LE: loop exit
PB: predicated region body
PF: predicated region fallthrough
CT: control target
= control target key end

     0   :  { %7 = vsyncpa [#allocation3], 0  ;;  %s266_s0 = inlined_call_operand.hbm [shape: f32[8,2,32], index: 0, kind: input, shape index: {}]   ;;  %s267_s1 = inlined_call_operand.hbm [shape: f32[8,1,32], index: 1, kind: input, shape index: {}]   ;;  %s268_s2 = inlined_call_operand.hbm [shape: f32[8,2,32], index: 2, kind: output, shape index: {}]  }
   0x1   :  { %8 = vsyncpa [#allocation6], 0 }
   0x2   :  { %9 = vsyncpa [#allocation4], 0  ;;  %s14_s11 = sshll.u32 %s266_s0, 4  ;;  %s214_s12 = smov [#allocation2]   ;;  %s15_s11 = int_to_ptr.hbm [resolvable:$true] %s14_s11 }
   0x3   :  { %s16_s13 = sshll.u32 %s214_s12, 4  ;;  %s27_s16 = sshll.u32 %s267_s1, 4  ;;  %s17_s13 = int_to_ptr.vmem [resolvable:$true] %s16_s13  ;;  %s28_s16 = int_to_ptr.hbm [resolvable:$true] %s27_s16 }
   0x4   :  { %s215_s17 = smov 32   ;;  %s216_s18 = smov 2  }
   0x5   :  { %22 = dma.hbm_to_vmem [thread:$0]  %s15_s11, 256, %s17_s13, [#allocation3], %s215_s17, %s215_s17, %s216_s18  }
   0x6   :  { %s217_s19 = smov [#allocation5]   ;;  %s218_s21 = smov 16  }
   0x7   :  { %s29_s20 = sshll.u32 %s217_s19, 4  ;;  %s219_s0 = smov 1   ;;  %s30_s20 = int_to_ptr.vmem [resolvable:$true] %s29_s20 }
   0x8   :  { %35 = dma.hbm_to_vmem [thread:$0]  %s28_s16, 128, %s30_s20, [#allocation6], %s218_s21, %s218_s21, %s219_s0  }
   0x9   :  { %208 = dma.done.wait [#allocation3], 256  }
   0xa   :  { %209 = vsyncadd [#allocation3], 4294967040 }
   0xb   :  { %210 = dma.done.wait [#allocation6], 128  }
   0xc   :  { %211 = vsyncadd [#allocation6], 4294967168  ;;  %vm92_vm0 = vcmask 254976   ;;  %s220_s22 = smov [#allocation7]   ;;  %s107_s25 = sshll.u32 %s268_s2, 4  ;;  %s108_s25 = int_to_ptr.hbm [resolvable:$true] %s107_s25 }
   0xd   :  { %s245_s1 = sshll.u32 %s220_s22, 4  ;;  %v44_v0 = vld [vmem:[#allocation2] sm:$0x3]  ;;  %v128_v1 = vld [vmem:[#allocation5] ss:$0 sm:$0xff]  ;;  %s106_s1 = int_to_ptr.vmem [resolvable:$true] %s245_s1 }
   0xe   :  { %v45_v2 = vld [vmem:[#allocation2 + $0x2] sm:$0x3]  ;;  %v129_v3 = vld [vmem:[#allocation5 + $0x1] ss:$0 sm:$0xff]  ;;  %v84_v4 = vadd.f32 %v128_v1, %v44_v0  ;;  %v46_v5 = vld [vmem:[#allocation2 + $0x4] sm:$0x3] }
   0xf   :  { %v130_v6 = vld [vmem:[#allocation5 + $0x2] ss:$0 sm:$0xff]  ;;  %v85_v7 = vadd.f32 %v129_v3, %v45_v2  ;;  %v47_v8 = vld [vmem:[#allocation2 + $0x6] sm:$0x3]  ;;  %v131_v9 = vld [vmem:[#allocation5 + $0x3] ss:$0 sm:$0xff] }
  0x10   :  { %93 = vst.msk [vmem:[#allocation7] sm:$0x3] %vm92_vm0, %v84_v4  ;;  %v86_v10 = vadd.f32 %v130_v6, %v46_v5  ;;  %v48_v11 = vld [vmem:[#allocation2 + $0x8] sm:$0x3]  ;;  %v87_v12 = vadd.f32 %v131_v9, %v47_v8  ;;  %v132_v13 = vld [vmem:[#allocation5 + $0x4] ss:$0 sm:$0xff] }
  0x11   :  { %94 = vst.msk [vmem:[#allocation7 + $0x2] sm:$0x3] %vm92_vm0, %v85_v7  ;;  %v49_v14 = vld [vmem:[#allocation2 + $0xa] sm:$0x3]  ;;  %v133_v15 = vld [vmem:[#allocation5 + $0x5] ss:$0 sm:$0xff]  ;;  %v88_v16 = vadd.f32 %v132_v13, %v48_v11 }
  0x12   :  { %95 = vst.msk [vmem:[#allocation7 + $0x4] sm:$0x3] %vm92_vm0, %v86_v10  ;;  %v50_v17 = vld [vmem:[#allocation2 + $0xc] sm:$0x3]  ;;  %v89_v18 = vadd.f32 %v133_v15, %v49_v14  ;;  %v134_v19 = vld [vmem:[#allocation5 + $0x6] ss:$0 sm:$0xff] }
  0x13   :  { %96 = vst.msk [vmem:[#allocation7 + $0x6] sm:$0x3] %vm92_vm0, %v87_v12  ;;  %v51_v20 = vld [vmem:[#allocation2 + $0xe] sm:$0x3]  ;;  %v135_v21 = vld [vmem:[#allocation5 + $0x7] ss:$0 sm:$0xff]  ;;  %v90_v22 = vadd.f32 %v134_v19, %v50_v17 }
  0x14   :  { %97 = vst.msk [vmem:[#allocation7 + $0x8] sm:$0x3] %vm92_vm0, %v88_v16  ;;  %v91_v23 = vadd.f32 %v135_v21, %v51_v20 }
  0x15   :  { %98 = vst.msk [vmem:[#allocation7 + $0xa] sm:$0x3] %vm92_vm0, %v89_v18 }
  0x16   :  { %99 = vst.msk [vmem:[#allocation7 + $0xc] sm:$0x3] %vm92_vm0, %v90_v22 }
  0x17   :  { %100 = vst.msk [vmem:[#allocation7 + $0xe] sm:$0x3] %vm92_vm0, %v91_v23 }
  0x18   :  { %113 = dma.vmem_to_hbm [thread:$0]  %s106_s1, 256, %s108_s25, [#allocation4], %s215_s17, %s215_s17, %s216_s18  }
  0x19   :  { %212 = dma.done.wait [#allocation4], 256  }
  0x1a   :  { %213 = vsyncadd [#allocation4], 4294967040 }
  0x1b   :  { %118 = vsyncpa [#allocation3], 1 }
  0x1c   :  { %119 = vsyncpa [#allocation6], 1 }
  0x1d   :  { %120 = vsyncpa [#allocation4], 1 }

</bundles_post_ra>
